<compile_context>
chip_gen: v6e
topology: v6e:2x2x1
jax: 0.10.0
libtpu: 0.0.40
codegen_flags: <defaults>
</compile_context>

<pallas_src>
import jax
import jax.numpy as jnp
from jax.experimental import pallas as pl
from jax.experimental.pallas import tpu as pltpu

NEG_POS_RATIO = 3        # config.NEG_POS_RATIO (PixelLink default)
LANES = 128
MAX_BLOCK_ROWS = 512     # 512x128 f32 = 256 KiB/block; all double-buffered streams stay far
                         # under v5e's 16 MiB scoped-VMEM default and v7x's 64 MiB physical VMEM.
ROW_ALIGN = 32           # satisfies int8 (32,128) and f32 (8,128) sublane-tiling rules


def _pick_block_rows(rows, max_rows=MAX_BLOCK_ROWS, align=ROW_ALIGN):
    """Largest multiple of `align` <= max_rows dividing `rows`; fall back to the full array."""
    best = 0
    t = align
    while t <= min(max_rows, rows):
        if rows % t == 0:
            best = t
        t += align
    return best if best > 0 else rows


def _pad_rows(x, mult):
    """Zero-pad the row dim of a [rows,128] array up to a multiple of `mult` (no-op if aligned)."""
    pad = (-x.shape[0]) % mult
    if pad == 0:
        return x
    return jnp.concatenate([x, jnp.zeros((pad, x.shape[1]), x.dtype)], axis=0)


def _softplus(z):
    # 2-class CE == softplus(z), z = logit[1-gt] - logit[gt]: only 2 transcendentals (exp + log).
    return jnp.maximum(z, 0.0) + jnp.log(1.0 + jnp.exp(-jnp.abs(z)))


def _fold_to_sublanes(p):
    # (T,128) -> (8,128) per-lane partial using vreg-wise adds only (VPU; no per-step XLU reduce).
    return jnp.sum(p.reshape(-1, 8, LANES), axis=0)


# ------------------------------- Pallas kernels -------------------------------- #

def _pixel_ce_kernel(l0_ref, l1_ref, gt_ref, ce_ref):
    l0 = l0_ref[...]
    l1 = l1_ref[...]
    gt_is_one = gt_ref[...].astype(jnp.float32) > 0.5
    ce_ref[...] = _softplus(jnp.where(gt_is_one, l0 - l1, l1 - l0))


def _link_reduce_kernel(l0_ref, l1_ref, gt_ref, pw_ref, gtn_ref, out_ref):
    # out_ref block (1,4,8,128) is resident across the "arbitrary" k axis -> accumulator.
    @pl.when(pl.program_id(1) == 0)
    def _():
        out_ref[...] = jnp.zeros_like(out_ref)

    l0 = l0_ref[...]
    l1 = l1_ref[...]
    gt_is_one = gt_ref[...].astype(jnp.float32) > 0.5
    ce = _softplus(jnp.where(gt_is_one, l0 - l1, l1 - l0))

    w = pw_ref[...]
    posw = jnp.where(gtn_ref[...].astype(jnp.float32) > 0.5, w, 0.0)
    negw = w - posw                       # link_gt is 0/1, so (gt==0) weight = w - (gt==1) weight

    out_ref[0, 0] += _fold_to_sublanes(posw * ce)
    out_ref[0, 1] += _fold_to_sublanes(negw * ce)
    out_ref[0, 2] += _fold_to_sublanes(posw)
    out_ref[0, 3] += _fold_to_sublanes(negw)


def _wsum_kernel(w_ref, x_ref, out_ref):
    @pl.when(pl.program_id(0) == 0)
    def _():
        out_ref[...] = jnp.zeros_like(out_ref)
    out_ref[...] += _fold_to_sublanes(w_ref[...] * x_ref[...])


# ----------------------------- pallas_call wrappers ----------------------------- #

def pixel_ce_pallas(l0, l1, gt8):
    rows = l0.shape[0]
    t = _pick_block_rows(rows)
    spec = pl.BlockSpec((t, LANES), lambda i: (i, 0))
    return pl.pallas_call(
        _pixel_ce_kernel,
        out_shape=jax.ShapeDtypeStruct((rows, LANES), jnp.float32),
        grid=(rows // t,),
        in_specs=[spec, spec, spec],
        out_specs=spec,
        compiler_params=pltpu.CompilerParams(dimension_semantics=("parallel",)),
    )(l0, l1, gt8)


def link_reduce_pallas(ll0, ll1, lgt8, pw_bnhw, lgtn8):
    rows = ll0.shape[0]
    assert rows % (2 * ROW_ALIGN) == 0          # caller pads
    n_chunks = 2                                # leading "parallel" axis -> v7x megacore
    rows_per_chunk = rows // n_chunks
    t = _pick_block_rows(rows_per_chunk)
    k_steps = rows_per_chunk // t
    in_spec = pl.BlockSpec((t, LANES), lambda c, k: (c * k_steps + k, 0))
    out = pl.pallas_call(
        _link_reduce_kernel,
        out_shape=jax.ShapeDtypeStruct((n_chunks, 4, 8, LANES), jnp.float32),
        grid=(n_chunks, k_steps),
        in_specs=[in_spec] * 5,
        out_specs=pl.BlockSpec((1, 4, 8, LANES), lambda c, k: (c, 0, 0, 0)),
        compiler_params=pltpu.CompilerParams(
            dimension_semantics=("parallel", "arbitrary")),
    )(ll0, ll1, lgt8, pw_bnhw, lgtn8)
    return jnp.sum(out, axis=(0, 2, 3))         # (4,) — one tiny cross-lane reduce, done once


def weighted_sum_pallas(w, x):
    rows = w.shape[0]
    assert rows % ROW_ALIGN == 0                # caller pads
    t = _pick_block_rows(rows)
    spec = pl.BlockSpec((t, LANES), lambda k: (k, 0))
    out = pl.pallas_call(
        _wsum_kernel,
        out_shape=jax.ShapeDtypeStruct((8, LANES), jnp.float32),
        grid=(rows // t,),
        in_specs=[spec, spec],
        out_specs=pl.BlockSpec((8, LANES), lambda k: (0, 0)),
        compiler_params=pltpu.CompilerParams(dimension_semantics=("arbitrary",)),
    )(w, x)
    return jnp.sum(out)


# --------------------------------- forward glue --------------------------------- #

def instance_balanced_ce_loss(pixel_pred, pixel_gt, pixel_weight, link_pred, link_gt):
    B, c2, H, W = pixel_pred.shape
    assert c2 == 2
    n = link_gt.shape[1]
    N = B * H * W
    M = N * n
    assert N % LANES == 0 and M % LANES == 0
    Rp = N // LANES
    Rl = M // LANES

    # --- pixel branch: 'b c h w -> (b h w) c' needs no transpose, channel slices already match ---
    pl0 = _pad_rows(pixel_pred[:, 0].reshape(Rp, LANES), ROW_ALIGN)
    pl1 = _pad_rows(pixel_pred[:, 1].reshape(Rp, LANES), ROW_ALIGN)
    pgt8 = _pad_rows(pixel_gt.reshape(Rp, LANES).astype(jnp.int8), ROW_ALIGN)
    pw = pixel_weight.reshape(N)

    pce = pixel_ce_pallas(pl0, pl1, pgt8).reshape(-1)[:N]   # drop zero-padded rows

    tot_area = jnp.sum(pixel_gt)                            # number of positive pixels
    tot_area_f = tot_area.astype(jnp.float32)

    # --- OHEM (plain JAX): value-only sort -> threshold at the n_neg-th largest negative loss.
    # Matches the torch top-k index selection except for exact float ties at the threshold /
    # the degenerate n_neg >= #negatives case.
    # TODO(synk): dynamic top-k / sort has no Pallas TPU primitive; it stays in XLA.
    temp_loss = jnp.where(pw != 0, 0.0, pce)
    n_neg = jnp.minimum(NEG_POS_RATIO * tot_area, N).astype(jnp.int32)
    sorted_desc = -jnp.sort(-temp_loss)
    thresh = sorted_desc[jnp.maximum(n_neg, 1) - 1]
    selected = (temp_loss >= thresh) & (n_neg > 0)
    pw_ohem = jnp.where(selected, 1.0, pw)

    pix_num = weighted_sum_pallas(
        _pad_rows(pw_ohem.reshape(Rp, LANES), ROW_ALIGN),
        _pad_rows(pce.reshape(Rp, LANES), ROW_ALIGN))
    pixel_loss = pix_num / ((1.0 + NEG_POS_RATIO) * tot_area_f)

    # --- link branch: 'b (m n) h w -> (b h w n) m', m=2 -> class-0 = channels [:n], class-1 = [n:]
    ll0 = jnp.transpose(link_pred[:, :n], (0, 2, 3, 1)).reshape(Rl, LANES)
    ll1 = jnp.transpose(link_pred[:, n:], (0, 2, 3, 1)).reshape(Rl, LANES)
    lgt8 = jnp.transpose(link_gt, (0, 2, 3, 1)).reshape(Rl, LANES).astype(jnp.int8)

    # pos/neg link weights are built INSIDE the kernel from pixel_weight broadcast in NCHW
    # (b,n,h,w) order and the NCHW-ordered int8 link gt; pairing them with the (b,h,w,n)-ordered
    # link CE at equal flat indices reproduces the torch `.view(-1)` flatten-order mismatch.
    # TODO(synk): confirm upstream that this mismatched pairing is actually intended.
    pw_bnhw = jnp.broadcast_to(pixel_weight, (B, n, H, W)).reshape(Rl, LANES)
    lgtn8 = link_gt.reshape(Rl, LANES).astype(jnp.int8)

    pad = 2 * ROW_ALIGN   # even split into the two "parallel" chunks, each 32-row aligned
    sums = link_reduce_pallas(
        _pad_rows(ll0, pad), _pad_rows(ll1, pad), _pad_rows(lgt8, pad),
        _pad_rows(pw_bnhw, pad), _pad_rows(lgtn8, pad))
    pos_ce, neg_ce, pos_w, neg_w = sums[0], sums[1], sums[2], sums[3]
    # Note: division by zero when there are no positive/negative links mirrors the reference.
    link_loss = pos_ce / pos_w + neg_ce / neg_w

    return pixel_loss, link_loss


# ------------------------------ pure-JAX reference ------------------------------- #

def _reference(pixel_pred, pixel_gt, pixel_weight, link_pred, link_gt):
    B, _, H, W = pixel_pred.shape
    n = link_gt.shape[1]
    N = B * H * W
    M = N * n

    pp = jnp.transpose(pixel_pred, (0, 2, 3, 1)).reshape(N, 2)
    pgt = jnp.transpose(pixel_gt, (0, 2, 3, 1)).reshape(N).astype(jnp.int32)
    pw = jnp.transpose(pixel_weight, (0, 2, 3, 1)).reshape(N)
    pce = -jnp.take_along_axis(jax.nn.log_softmax(pp, -1), pgt[:, None], -1)[:, 0]
    tot_area = jnp.sum(pgt)

    temp = jnp.where(pw != 0, 0.0, pce)
    order = jnp.argsort(-temp)
    ranks = jnp.zeros(N, jnp.int32).at[order].set(jnp.arange(N, dtype=jnp.int32))
    pw2 = jnp.where(ranks < NEG_POS_RATIO * tot_area, 1.0, pw)
    pixel_loss = jnp.sum(pw2 * pce) / ((1.0 + NEG_POS_RATIO) * tot_area.astype(jnp.float32))

    lp = jnp.transpose(link_pred.reshape(B, 2, n, H, W), (0, 3, 4, 2, 1)).reshape(M, 2)
    lgt = jnp.transpose(link_gt, (0, 2, 3, 1)).reshape(M).astype(jnp.int32)
    lce = -jnp.take_along_axis(jax.nn.log_softmax(lp, -1), lgt[:, None], -1)[:, 0]
    posw = (pixel_weight * (link_gt == 1)).reshape(M)
    negw = (pixel_weight * (link_gt == 0)).reshape(M)
    link_loss = jnp.sum(posw * lce) / jnp.sum(posw) + jnp.sum(negw * lce) / jnp.sum(negw)
    return pixel_loss, link_loss


# ------------------------------------- main -------------------------------------- #

if __name__ == "__main__":
    B, H, W = 2, 16, 16
    NNEIGH = 8   # PixelLink uses 8 neighbor links

    key = jax.random.PRNGKey(0)
    k1, k2, k3, k4, k5 = jax.random.split(key, 5)

    pixel_pred = jax.random.normal(k1, (B, 2, H, W), jnp.float32)
    # keep positives sparse so NEG_POS_RATIO * tot_area < #negatives (non-degenerate OHEM regime)
    pixel_gt = jax.random.bernoulli(k2, 0.15, (B, 1, H, W)).astype(jnp.int32)
    pixel_weight = pixel_gt.astype(jnp.float32) * jax.random.uniform(
        k3, (B, 1, H, W), jnp.float32, 0.5, 1.5)
    link_pred = jax.random.normal(k4, (B, 2 * NNEIGH, H, W), jnp.float32)
    link_gt = jax.random.bernoulli(k5, 0.5, (B, NNEIGH, H, W)).astype(jnp.int32)

    fwd = jax.jit(instance_balanced_ce_loss)
    pixel_loss, link_loss = fwd(pixel_pred, pixel_gt, pixel_weight, link_pred, link_gt)
    jax.block_until_ready((pixel_loss, link_loss))

    ref_pixel, ref_link = _reference(pixel_pred, pixel_gt, pixel_weight, link_pred, link_gt)
    assert jnp.allclose(pixel_loss, ref_pixel, rtol=1e-3, atol=1e-4), (pixel_loss, ref_pixel)
    assert jnp.allclose(link_loss, ref_link, rtol=1e-3, atol=1e-4), (link_loss, ref_link)

    print("KERNEL_OK")
</pallas_src>

<mosaic_0001>
module attributes {stable_mosaic.version = 11 : i64} {
  func.func @_pixel_ce_kernel(%arg0: i32, %arg1: memref<32x128xf32, #tpu.memory_space<vmem>>, %arg2: memref<32x128xf32, #tpu.memory_space<vmem>>, %arg3: memref<32x128xi8, #tpu.memory_space<vmem>>, %arg4: memref<32x128xf32, #tpu.memory_space<vmem>>) attributes {dimension_semantics = [#tpu.dimension_semantics<parallel>], iteration_bounds = array<i64: 1>, scalar_prefetch = 0 : i64, scratch_operands = 0 : i64, tpu.core_type = #tpu.core_type<tc>, window_params = [{transform_indices = @transform_0, window_bounds = array<i64: 32, 128>}, {transform_indices = @transform_1, window_bounds = array<i64: 32, 128>}, {transform_indices = @transform_2, window_bounds = array<i64: 32, 128>}, {transform_indices = @transform_3, window_bounds = array<i64: 32, 128>}]} {
    %c0 = arith.constant 0 : index
    %c0_0 = arith.constant 0 : index
    %0 = vector.load %arg1[%c0, %c0_0] : memref<32x128xf32, #tpu.memory_space<vmem>>, vector<32x128xf32>
    %c0_1 = arith.constant 0 : index
    %c0_2 = arith.constant 0 : index
    %1 = vector.load %arg2[%c0_1, %c0_2] : memref<32x128xf32, #tpu.memory_space<vmem>>, vector<32x128xf32>
    %c0_3 = arith.constant 0 : index
    %c0_4 = arith.constant 0 : index
    %2 = vector.load %arg3[%c0_3, %c0_4] : memref<32x128xi8, #tpu.memory_space<vmem>>, vector<32x128xi8>
    %3 = arith.sitofp %2 : vector<32x128xi8> to vector<32x128xf32>
    %cst = arith.constant 5.000000e-01 : f32
    %4 = vector.broadcast %cst : f32 to vector<32x128xf32>
    %5 = arith.cmpf ogt, %3, %4 : vector<32x128xf32>
    %6 = arith.subf %0, %1 : vector<32x128xf32>
    %7 = arith.subf %1, %0 : vector<32x128xf32>
    %8 = arith.select %5, %6, %7 : vector<32x128xi1>, vector<32x128xf32>
    %cst_5 = arith.constant 0.000000e+00 : f32
    %9 = vector.broadcast %cst_5 : f32 to vector<32x128xf32>
    %10 = arith.maximumf %8, %9 : vector<32x128xf32>
    %11 = math.absf %8 : vector<32x128xf32>
    %cst_6 = arith.constant 0.000000e+00 : f32
    %12 = vector.broadcast %cst_6 : f32 to vector<32x128xf32>
    %13 = arith.subf %12, %11 : vector<32x128xf32>
    %14 = math.exp %13 : vector<32x128xf32>
    %cst_7 = arith.constant 1.000000e+00 : f32
    %15 = vector.broadcast %cst_7 : f32 to vector<32x128xf32>
    %16 = arith.addf %15, %14 : vector<32x128xf32>
    %17 = math.log %16 : vector<32x128xf32>
    %18 = arith.addf %10, %17 : vector<32x128xf32>
    %c0_8 = arith.constant 0 : index
    %c0_9 = arith.constant 0 : index
    %19 = vector.load %arg4[%c0_8, %c0_9] : memref<32x128xf32, #tpu.memory_space<vmem>>, vector<32x128xf32>
    tpu.vector_store %arg4[%c0_8, %c0_9], %18 {strides = array<i32>} : memref<32x128xf32, #tpu.memory_space<vmem>>, vector<32x128xf32>,
    return
  }
  func.func @transform_0(%arg0: i32) -> (i32, i32) {
    %c0_i32 = arith.constant 0 : i32
    %c0_i32_0 = arith.constant 0 : i32
    return %arg0, %c0_i32 : i32, i32
  }
  func.func @transform_1(%arg0: i32) -> (i32, i32) {
    %c0_i32 = arith.constant 0 : i32
    %c0_i32_0 = arith.constant 0 : i32
    return %arg0, %c0_i32 : i32, i32
  }
  func.func @transform_2(%arg0: i32) -> (i32, i32) {
    %c0_i32 = arith.constant 0 : i32
    %c0_i32_0 = arith.constant 0 : i32
    return %arg0, %c0_i32 : i32, i32
  }
  func.func @transform_3(%arg0: i32) -> (i32, i32) {
    %c0_i32 = arith.constant 0 : i32
    %c0_i32_0 = arith.constant 0 : i32
    return %arg0, %c0_i32 : i32, i32
  }
}

module attributes {stable_mosaic.version = 11 : i64} {
  func.func @_wsum_kernel(%arg0: i32, %arg1: memref<32x128xf32, #tpu.memory_space<vmem>>, %arg2: memref<32x128xf32, #tpu.memory_space<vmem>>, %arg3: memref<8x128xf32, #tpu.memory_space<vmem>>) attributes {dimension_semantics = [#tpu.dimension_semantics<arbitrary>], iteration_bounds = array<i64: 1>, scalar_prefetch = 0 : i64, scratch_operands = 0 : i64, tpu.core_type = #tpu.core_type<tc>, window_params = [{transform_indices = @transform_0, window_bounds = array<i64: 32, 128>}, {transform_indices = @transform_1, window_bounds = array<i64: 32, 128>}, {pipeline_mode = #tpu.pipeline_mode<synchronous>, transform_indices = @transform_2, window_bounds = array<i64: 8, 128>}]} {
    %c0_i32 = arith.constant 0 : i32
    %0 = arith.cmpi eq, %arg0, %c0_i32 : i32
    %1 = arith.extui %0 : i1 to i32
    %c0_i32_0 = arith.constant 0 : i32
    %2 = arith.cmpi ne, %1, %c0_i32_0 : i32
    scf.if %2 {
      %cst_8 = arith.constant 0.000000e+00 : f32
      %11 = vector.broadcast %cst_8 : f32 to vector<8x128xf32>
      %c0_9 = arith.constant 0 : index
      %c0_10 = arith.constant 0 : index
      %12 = vector.load %arg3[%c0_9, %c0_10] : memref<8x128xf32, #tpu.memory_space<vmem>>, vector<8x128xf32>
      tpu.vector_store %arg3[%c0_9, %c0_10], %11 {strides = array<i32>} : memref<8x128xf32, #tpu.memory_space<vmem>>, vector<8x128xf32>,
    } else {
    }
    %c0 = arith.constant 0 : index
    %c0_1 = arith.constant 0 : index
    %3 = vector.load %arg3[%c0, %c0_1] : memref<8x128xf32, #tpu.memory_space<vmem>>, vector<8x128xf32>
    %c0_2 = arith.constant 0 : index
    %c0_3 = arith.constant 0 : index
    %4 = vector.load %arg1[%c0_2, %c0_3] : memref<32x128xf32, #tpu.memory_space<vmem>>, vector<32x128xf32>
    %c0_4 = arith.constant 0 : index
    %c0_5 = arith.constant 0 : index
    %5 = vector.load %arg2[%c0_4, %c0_5] : memref<32x128xf32, #tpu.memory_space<vmem>>, vector<32x128xf32>
    %6 = arith.mulf %4, %5 : vector<32x128xf32>
    %7 = vector.shape_cast %6 : vector<32x128xf32> to vector<4x8x128xf32>
    %cst = arith.constant dense<0.000000e+00> : vector<8x128xf32>
    %8 = vector.multi_reduction <add>, %7, %cst [0] : vector<4x8x128xf32> to vector<8x128xf32>
    %9 = arith.addf %3, %8 : vector<8x128xf32>
    %c0_6 = arith.constant 0 : index
    %c0_7 = arith.constant 0 : index
    %10 = vector.load %arg3[%c0_6, %c0_7] : memref<8x128xf32, #tpu.memory_space<vmem>>, vector<8x128xf32>
    tpu.vector_store %arg3[%c0_6, %c0_7], %9 {strides = array<i32>} : memref<8x128xf32, #tpu.memory_space<vmem>>, vector<8x128xf32>,
    return
  }
  func.func @transform_0(%arg0: i32) -> (i32, i32) {
    %c0_i32 = arith.constant 0 : i32
    %c0_i32_0 = arith.constant 0 : i32
    return %arg0, %c0_i32 : i32, i32
  }
  func.func @transform_1(%arg0: i32) -> (i32, i32) {
    %c0_i32 = arith.constant 0 : i32
    %c0_i32_0 = arith.constant 0 : i32
    return %arg0, %c0_i32 : i32, i32
  }
  func.func @transform_2(%arg0: i32) -> (i32, i32) {
    %c0_i32 = arith.constant 0 : i32
    %c0_i32_0 = arith.constant 0 : i32
    %c0_i32_1 = arith.constant 0 : i32
    return %c0_i32, %c0_i32_0 : i32, i32
  }
}

module attributes {stable_mosaic.version = 11 : i64} {
  func.func @_link_reduce_kernel(%arg0: i32, %arg1: i32, %arg2: memref<32x128xf32, #tpu.memory_space<vmem>>, %arg3: memref<32x128xf32, #tpu.memory_space<vmem>>, %arg4: memref<32x128xi8, #tpu.memory_space<vmem>>, %arg5: memref<32x128xf32, #tpu.memory_space<vmem>>, %arg6: memref<32x128xi8, #tpu.memory_space<vmem>>, %arg7: memref<1x4x8x128xf32, #tpu.memory_space<vmem>>) attributes {dimension_semantics = [#tpu.dimension_semantics<parallel>, #tpu.dimension_semantics<arbitrary>], iteration_bounds = array<i64: 2, 1>, scalar_prefetch = 0 : i64, scratch_operands = 0 : i64, tpu.core_type = #tpu.core_type<tc>, window_params = [{transform_indices = @transform_0, window_bounds = array<i64: 32, 128>}, {transform_indices = @transform_1, window_bounds = array<i64: 32, 128>}, {transform_indices = @transform_2, window_bounds = array<i64: 32, 128>}, {transform_indices = @transform_3, window_bounds = array<i64: 32, 128>}, {transform_indices = @transform_4, window_bounds = array<i64: 32, 128>}, {transform_indices = @transform_5, window_bounds = array<i64: 1, 4, 8, 128>}]} {
    %c0_i32 = arith.constant 0 : i32
    %0 = arith.cmpi eq, %arg1, %c0_i32 : i32
    %1 = arith.extui %0 : i1 to i32
    %c0_i32_0 = arith.constant 0 : i32
    %2 = arith.cmpi ne, %1, %c0_i32_0 : i32
    scf.if %2 {
      %cst_48 = arith.constant 0.000000e+00 : f32
      %64 = vector.broadcast %cst_48 : f32 to vector<1x4x8x128xf32>
      %c0_49 = arith.constant 0 : index
      %c0_50 = arith.constant 0 : index
      %c0_51 = arith.constant 0 : index
      %c0_52 = arith.constant 0 : index
      %65 = vector.load %arg7[%c0_49, %c0_50, %c0_51, %c0_52] : memref<1x4x8x128xf32, #tpu.memory_space<vmem>>, vector<1x4x8x128xf32>
      tpu.vector_store %arg7[%c0_49, %c0_50, %c0_51, %c0_52], %64 {strides = array<i32>} : memref<1x4x8x128xf32, #tpu.memory_space<vmem>>, vector<1x4x8x128xf32>,
    } else {
    }
    %c0 = arith.constant 0 : index
    %c0_1 = arith.constant 0 : index
    %3 = vector.load %arg2[%c0, %c0_1] : memref<32x128xf32, #tpu.memory_space<vmem>>, vector<32x128xf32>
    %c0_2 = arith.constant 0 : index
    %c0_3 = arith.constant 0 : index
    %4 = vector.load %arg3[%c0_2, %c0_3] : memref<32x128xf32, #tpu.memory_space<vmem>>, vector<32x128xf32>
    %c0_4 = arith.constant 0 : index
    %c0_5 = arith.constant 0 : index
    %5 = vector.load %arg4[%c0_4, %c0_5] : memref<32x128xi8, #tpu.memory_space<vmem>>, vector<32x128xi8>
    %6 = arith.sitofp %5 : vector<32x128xi8> to vector<32x128xf32>
    %cst = arith.constant 5.000000e-01 : f32
    %7 = vector.broadcast %cst : f32 to vector<32x128xf32>
    %8 = arith.cmpf ogt, %6, %7 : vector<32x128xf32>
    %9 = arith.subf %3, %4 : vector<32x128xf32>
    %10 = arith.subf %4, %3 : vector<32x128xf32>
    %11 = arith.select %8, %9, %10 : vector<32x128xi1>, vector<32x128xf32>
    %cst_6 = arith.constant 0.000000e+00 : f32
    %12 = vector.broadcast %cst_6 : f32 to vector<32x128xf32>
    %13 = arith.maximumf %11, %12 : vector<32x128xf32>
    %14 = math.absf %11 : vector<32x128xf32>
    %cst_7 = arith.constant 0.000000e+00 : f32
    %15 = vector.broadcast %cst_7 : f32 to vector<32x128xf32>
    %16 = arith.subf %15, %14 : vector<32x128xf32>
    %17 = math.exp %16 : vector<32x128xf32>
    %cst_8 = arith.constant 1.000000e+00 : f32
    %18 = vector.broadcast %cst_8 : f32 to vector<32x128xf32>
    %19 = arith.addf %18, %17 : vector<32x128xf32>
    %20 = math.log %19 : vector<32x128xf32>
    %21 = arith.addf %13, %20 : vector<32x128xf32>
    %c0_9 = arith.constant 0 : index
    %c0_10 = arith.constant 0 : index
    %22 = vector.load %arg5[%c0_9, %c0_10] : memref<32x128xf32, #tpu.memory_space<vmem>>, vector<32x128xf32>
    %c0_11 = arith.constant 0 : index
    %c0_12 = arith.constant 0 : index
    %23 = vector.load %arg6[%c0_11, %c0_12] : memref<32x128xi8, #tpu.memory_space<vmem>>, vector<32x128xi8>
    %24 = arith.sitofp %23 : vector<32x128xi8> to vector<32x128xf32>
    %cst_13 = arith.constant 5.000000e-01 : f32
    %25 = vector.broadcast %cst_13 : f32 to vector<32x128xf32>
    %26 = arith.cmpf ogt, %24, %25 : vector<32x128xf32>
    %cst_14 = arith.constant 0.000000e+00 : f32
    %27 = vector.broadcast %cst_14 : f32 to vector<32x128xf32>
    %28 = arith.select %26, %22, %27 : vector<32x128xi1>, vector<32x128xf32>
    %29 = arith.subf %22, %28 : vector<32x128xf32>
    %c0_15 = arith.constant 0 : index
    %c0_16 = arith.constant 0 : index
    %c0_17 = arith.constant 0 : index
    %c0_18 = arith.constant 0 : index
    %30 = vector.load %arg7[%c0_15, %c0_16, %c0_17, %c0_18] : memref<1x4x8x128xf32, #tpu.memory_space<vmem>>, vector<1x1x8x128xf32>
    %31 = vector.shape_cast %30 : vector<1x1x8x128xf32> to vector<8x128xf32>
    %32 = arith.mulf %28, %21 : vector<32x128xf32>
    %33 = vector.shape_cast %32 : vector<32x128xf32> to vector<4x8x128xf32>
    %cst_19 = arith.constant dense<0.000000e+00> : vector<8x128xf32>
    %34 = vector.multi_reduction <add>, %33, %cst_19 [0] : vector<4x8x128xf32> to vector<8x128xf32>
    %35 = arith.addf %31, %34 : vector<8x128xf32>
    %c0_20 = arith.constant 0 : index
    %c0_21 = arith.constant 0 : index
    %c0_22 = arith.constant 0 : index
    %c0_23 = arith.constant 0 : index
    %36 = vector.load %arg7[%c0_20, %c0_21, %c0_22, %c0_23] : memref<1x4x8x128xf32, #tpu.memory_space<vmem>>, vector<1x1x8x128xf32>
    %37 = vector.shape_cast %36 : vector<1x1x8x128xf32> to vector<8x128xf32>
    %38 = vector.shape_cast %35 : vector<8x128xf32> to vector<1x1x8x128xf32>
    tpu.vector_store %arg7[%c0_20, %c0_21, %c0_22, %c0_23], %38 {strides = array<i32>} : memref<1x4x8x128xf32, #tpu.memory_space<vmem>>, vector<1x1x8x128xf32>,
    %c0_24 = arith.constant 0 : index
    %c1 = arith.constant 1 : index
    %c0_25 = arith.constant 0 : index
    %c0_26 = arith.constant 0 : index
    %39 = vector.load %arg7[%c0_24, %c1, %c0_25, %c0_26] : memref<1x4x8x128xf32, #tpu.memory_space<vmem>>, vector<1x1x8x128xf32>
    %40 = vector.shape_cast %39 : vector<1x1x8x128xf32> to vector<8x128xf32>
    %41 = arith.mulf %29, %21 : vector<32x128xf32>
    %42 = vector.shape_cast %41 : vector<32x128xf32> to vector<4x8x128xf32>
    %cst_27 = arith.constant dense<0.000000e+00> : vector<8x128xf32>
    %43 = vector.multi_reduction <add>, %42, %cst_27 [0] : vector<4x8x128xf32> to vector<8x128xf32>
    %44 = arith.addf %40, %43 : vector<8x128xf32>
    %c0_28 = arith.constant 0 : index
    %c1_29 = arith.constant 1 : index
    %c0_30 = arith.constant 0 : index
    %c0_31 = arith.constant 0 : index
    %45 = vector.load %arg7[%c0_28, %c1_29, %c0_30, %c0_31] : memref<1x4x8x128xf32, #tpu.memory_space<vmem>>, vector<1x1x8x128xf32>
    %46 = vector.shape_cast %45 : vector<1x1x8x128xf32> to vector<8x128xf32>
    %47 = vector.shape_cast %44 : vector<8x128xf32> to vector<1x1x8x128xf32>
    tpu.vector_store %arg7[%c0_28, %c1_29, %c0_30, %c0_31], %47 {strides = array<i32>} : memref<1x4x8x128xf32, #tpu.memory_space<vmem>>, vector<1x1x8x128xf32>,
    %c0_32 = arith.constant 0 : index
    %c2 = arith.constant 2 : index
    %c0_33 = arith.constant 0 : index
    %c0_34 = arith.constant 0 : index
    %48 = vector.load %arg7[%c0_32, %c2, %c0_33, %c0_34] : memref<1x4x8x128xf32, #tpu.memory_space<vmem>>, vector<1x1x8x128xf32>
    %49 = vector.shape_cast %48 : vector<1x1x8x128xf32> to vector<8x128xf32>
    %50 = vector.shape_cast %28 : vector<32x128xf32> to vector<4x8x128xf32>
    %cst_35 = arith.constant dense<0.000000e+00> : vector<8x128xf32>
    %51 = vector.multi_reduction <add>, %50, %cst_35 [0] : vector<4x8x128xf32> to vector<8x128xf32>
    %52 = arith.addf %49, %51 : vector<8x128xf32>
    %c0_36 = arith.constant 0 : index
    %c2_37 = arith.constant 2 : index
    %c0_38 = arith.constant 0 : index
    %c0_39 = arith.constant 0 : index
    %53 = vector.load %arg7[%c0_36, %c2_37, %c0_38, %c0_39] : memref<1x4x8x128xf32, #tpu.memory_space<vmem>>, vector<1x1x8x128xf32>
    %54 = vector.shape_cast %53 : vector<1x1x8x128xf32> to vector<8x128xf32>
    %55 = vector.shape_cast %52 : vector<8x128xf32> to vector<1x1x8x128xf32>
    tpu.vector_store %arg7[%c0_36, %c2_37, %c0_38, %c0_39], %55 {strides = array<i32>} : memref<1x4x8x128xf32, #tpu.memory_space<vmem>>, vector<1x1x8x128xf32>,
    %c0_40 = arith.constant 0 : index
    %c3 = arith.constant 3 : index
    %c0_41 = arith.constant 0 : index
    %c0_42 = arith.constant 0 : index
    %56 = vector.load %arg7[%c0_40, %c3, %c0_41, %c0_42] : memref<1x4x8x128xf32, #tpu.memory_space<vmem>>, vector<1x1x8x128xf32>
    %57 = vector.shape_cast %56 : vector<1x1x8x128xf32> to vector<8x128xf32>
    %58 = vector.shape_cast %29 : vector<32x128xf32> to vector<4x8x128xf32>
    %cst_43 = arith.constant dense<0.000000e+00> : vector<8x128xf32>
    %59 = vector.multi_reduction <add>, %58, %cst_43 [0] : vector<4x8x128xf32> to vector<8x128xf32>
    %60 = arith.addf %57, %59 : vector<8x128xf32>
    %c0_44 = arith.constant 0 : index
    %c3_45 = arith.constant 3 : index
    %c0_46 = arith.constant 0 : index
    %c0_47 = arith.constant 0 : index
    %61 = vector.load %arg7[%c0_44, %c3_45, %c0_46, %c0_47] : memref<1x4x8x128xf32, #tpu.memory_space<vmem>>, vector<1x1x8x128xf32>
    %62 = vector.shape_cast %61 : vector<1x1x8x128xf32> to vector<8x128xf32>
    %63 = vector.shape_cast %60 : vector<8x128xf32> to vector<1x1x8x128xf32>
    tpu.vector_store %arg7[%c0_44, %c3_45, %c0_46, %c0_47], %63 {strides = array<i32>} : memref<1x4x8x128xf32, #tpu.memory_space<vmem>>, vector<1x1x8x128xf32>,
    return
  }
  func.func @transform_0(%arg0: i32, %arg1: i32) -> (i32, i32) {
    %c1_i32 = arith.constant 1 : i32
    %0 = arith.muli %arg0, %c1_i32 : i32
    %1 = arith.addi %0, %arg1 : i32
    %c0_i32 = arith.constant 0 : i32
    %c0_i32_0 = arith.constant 0 : i32
    return %1, %c0_i32 : i32, i32
  }
  func.func @transform_1(%arg0: i32, %arg1: i32) -> (i32, i32) {
    %c1_i32 = arith.constant 1 : i32
    %0 = arith.muli %arg0, %c1_i32 : i32
    %1 = arith.addi %0, %arg1 : i32
    %c0_i32 = arith.constant 0 : i32
    %c0_i32_0 = arith.constant 0 : i32
    return %1, %c0_i32 : i32, i32
  }
  func.func @transform_2(%arg0: i32, %arg1: i32) -> (i32, i32) {
    %c1_i32 = arith.constant 1 : i32
    %0 = arith.muli %arg0, %c1_i32 : i32
    %1 = arith.addi %0, %arg1 : i32
    %c0_i32 = arith.constant 0 : i32
    %c0_i32_0 = arith.constant 0 : i32
    return %1, %c0_i32 : i32, i32
  }
  func.func @transform_3(%arg0: i32, %arg1: i32) -> (i32, i32) {
    %c1_i32 = arith.constant 1 : i32
    %0 = arith.muli %arg0, %c1_i32 : i32
    %1 = arith.addi %0, %arg1 : i32
    %c0_i32 = arith.constant 0 : i32
    %c0_i32_0 = arith.constant 0 : i32
    return %1, %c0_i32 : i32, i32
  }
  func.func @transform_4(%arg0: i32, %arg1: i32) -> (i32, i32) {
    %c1_i32 = arith.constant 1 : i32
    %0 = arith.muli %arg0, %c1_i32 : i32
    %1 = arith.addi %0, %arg1 : i32
    %c0_i32 = arith.constant 0 : i32
    %c0_i32_0 = arith.constant 0 : i32
    return %1, %c0_i32 : i32, i32
  }
  func.func @transform_5(%arg0: i32, %arg1: i32) -> (i32, i32, i32, i32) {
    %c0_i32 = arith.constant 0 : i32
    %c0_i32_0 = arith.constant 0 : i32
    %c0_i32_1 = arith.constant 0 : i32
    %c0_i32_2 = arith.constant 0 : i32
    return %arg0, %c0_i32, %c0_i32_0, %c0_i32_1 : i32, i32, i32, i32
  }
}

</mosaic_0001>

<bundles_post_ra>
// kernel: squeeze.7
= control target key start
LH: loop header
LB: loop body
LE: loop exit
PB: predicated region body
PF: predicated region fallthrough
CT: control target
= control target key end

     0   :  { %s69_s8 = smov 112   ;;  %s70_s11 = smov 80   ;;  %vm3_vm0 = vcmask 130048   ;;  %vm9_vm1 = vcmask 1048448   ;;  %vm15_vm2 = vcmask 917248   ;;  %vm21_vm3 = vcmask 786048   ;;  %s113_s0 = inlined_call_operand.vmem [shape: f32[2,1,16,16], index: 0, kind: input, shape index: {}]   ;;  %s114_s1 = inlined_call_operand.vmem [shape: f32[4,128], index: 1, kind: output, shape index: {}]  }
   0x1   :  { %v55_v0 = vld [vmem:[%s113_s0 + $0x7] ss:$8 sm:$0xf]   ;;  %v57_v1 = vld [vmem:[%s113_s0 + $0x5] ss:$8 sm:$0xf]  }
   0x2   :  { %7 = vrot.lane.b32.xlu0 %v55_v0, %s69_s8  ;;  %19 = vrot.lane.b32.xlu1 %v57_v1, %s70_s11  ;;  %v56_v2 = vld [vmem:[%s113_s0 + $0x6] ss:$8 sm:$0xf]   ;;  %v58_v3 = vld [vmem:[%s113_s0 + $0x4] ss:$8 sm:$0xf]  }
   0x3   :  { %s71_s16 = smov 96   ;;  %v2_v4 = vld [vmem:[%s113_s0] ss:$8 sm:$0xf]   ;;  %s72_s19 = smov 64   ;;  %vm27_vm4 = vcmask 654848  }
   0x4   :  { %v59_v5 = vld [vmem:[%s113_s0 + $0x3] ss:$8 sm:$0xf]   ;;  %4 = vst.msk [vmem:[#allocation0] sm:$0xf] %vm3_vm0, %v2_v4   ;;  %s73_s24 = smov 48  }
   0x5   :  { %v60_v6 = vld [vmem:[%s113_s0 + $0x2] ss:$8 sm:$0xf]   ;;  %s74_s25 = smov 32   ;;  %vm33_vm5 = vcmask 523648   ;;  %vm39_vm6 = vcmask 392448  }
   0x6   :  { %13 = vrot.lane.b32.xlu0 %v56_v2, %s71_s16  ;;  %25 = vrot.lane.b32.xlu1 %v58_v3, %s72_s19  ;;  %v61_v7 = vld [vmem:[%s113_s0 + $0x1] ss:$8 sm:$0xf]   ;;  %s75_s0 = smov 16   ;;  %vm45_vm7 = vcmask 261248  }
   0xa   :  { %31 = vrot.lane.b32.xlu0 %v59_v5, %s73_s24  ;;  %37 = vrot.lane.b32.xlu1 %v60_v6, %s74_s25 }
   0xe   :  { %43 = vrot.lane.b32.xlu0 %v61_v7, %s75_s0 }
  0x74   :  { %v8_v8 = vpop.permute.xlu0 %7   ;;  %v20_v9 = vpop.permute.xlu1 %19  }
  0x75   :  { %10 = vst.msk [vmem:[#allocation0] sm:$0xf] %vm9_vm1, %v8_v8  }
  0x78   :  { %v14_v10 = vpop.permute.xlu0 %13   ;;  %v26_v11 = vpop.permute.xlu1 %25  }
  0x79   :  { %16 = vst.msk [vmem:[#allocation0] sm:$0xf] %vm15_vm2, %v14_v10  }
  0x7a   :  { %22 = vst.msk [vmem:[#allocation0] sm:$0xf] %vm21_vm3, %v20_v9  }
  0x7b   :  { %28 = vst.msk [vmem:[#allocation0] sm:$0xf] %vm27_vm4, %v26_v11  }
  0x7c   :  { %v32_v12 = vpop.permute.xlu0 %31   ;;  %v38_v13 = vpop.permute.xlu1 %37  }
  0x7d   :  { %34 = vst.msk [vmem:[#allocation0] sm:$0xf] %vm33_vm5, %v32_v12  }
  0x7e   :  { %40 = vst.msk [vmem:[#allocation0] sm:$0xf] %vm39_vm6, %v38_v13  }
  0x80   :  { %v44_v14 = vpop.permute.xlu0 %43  }
  0x81   :  { %46 = vst.msk [vmem:[#allocation0] sm:$0xf] %vm45_vm7, %v44_v14  }
  0x88   :  { %v51_v15 = vld [vmem:[#allocation0] sm:$0xf] }
  0x89   :  { %54 = vst [vmem:[%s114_s1] sm:$0xf] %v51_v15 }

// kernel: neg.3
= control target key start
LH: loop header
LB: loop body
LE: loop exit
PB: predicated region body
PF: predicated region fallthrough
CT: control target
= control target key end

     0   :  { %s24_s0 = inlined_call_operand.vmem [shape: f32[512], index: 0, kind: input, shape index: {}]   ;;  %s25_s1 = inlined_call_operand.vmem [shape: f32[512], index: 1, kind: output, shape index: {}]  }
   0x1   :  { %v2_v0 = vld [vmem:[%s24_s0] sm:$0xf] }
   0x2   :  { %v5_v1 = vxor.u32 2147483648, %v2_v0 }
   0x4   :  { %7 = vst [vmem:[%s25_s1] sm:$0xf] %v5_v1 }

// kernel: instance_balanced_ce_loss.3
= control target key start
LH: loop header
LB: loop body
LE: loop exit
PB: predicated region body
PF: predicated region fallthrough
CT: control target
= control target key end

     0   :  { %s166_s0 = inlined_call_operand.vmem [shape: f32[32,128], index: 0, kind: input, shape index: {}]   ;;  %s167_s1 = inlined_call_operand.vmem [shape: f32[32,128], index: 1, kind: input, shape index: {}]   ;;  %s168_s2 = inlined_call_operand.vmem [shape: s8[32,128], index: 2, kind: input, shape index: {}]   ;;  %s169_s3 = inlined_call_operand.vmem [shape: f32[32,128], index: 3, kind: output, shape index: {}]  }
   0x1   :  { %v14_v0 = vld [vmem:[%s166_s0] sm:$0xff]  ;;  %v15_v6 = vld [vmem:[%s166_s0 + $0x8] sm:$0xff]  ;;  %v16_v9 = vld [vmem:[%s166_s0 + $0x10] sm:$0xff] }
   0x2   :  { %v18_v1 = vld [vmem:[%s167_s1] sm:$0xff]  ;;  %v19_v7 = vld [vmem:[%s167_s1 + $0x8] sm:$0xff]  ;;  %v20_v12 = vld [vmem:[%s167_s1 + $0x10] sm:$0xff] }
   0x3   :  { %v22_v2 = vld [vmem:[%s168_s2] sm:$0xff]  ;;  %v35_v4 = vsub.f32 %v14_v0, %v18_v1  ;;  %v39_v5 = vsub.f32 %v18_v1, %v14_v0  ;;  %v36_v10 = vsub.f32 %v15_v6, %v19_v7  ;;  %v40_v11 = vsub.f32 %v19_v7, %v15_v6  ;;  %v17_v14 = vld [vmem:[%s166_s0 + $0x18] sm:$0xff] }
   0x4   :  { %v23_v3 = vunpack.c.0.s8 %v22_v2  ;;  %v24_v8 = vunpack.c.1.s8 %v22_v2  ;;  %v25_v13 = vunpack.c.2.s8 %v22_v2  ;;  %v21_v15 = vld [vmem:[%s167_s1 + $0x18] sm:$0xff]  ;;  %v26_v16 = vunpack.c.3.s8 %v22_v2 }
   0x5   :  { %v37_v19 = vsub.f32 %v16_v9, %v20_v12  ;;  %v41_v20 = vsub.f32 %v20_v12, %v16_v9  ;;  %v38_v23 = vsub.f32 %v17_v14, %v21_v15  ;;  %v42_v24 = vsub.f32 %v21_v15, %v17_v14 }
   0x6   :  { %v27_v17 = vcvt.s32.f32 %v23_v3  ;;  %v28_v18 = vcvt.s32.f32 %v24_v8  ;;  %v29_v21 = vcvt.s32.f32 %v25_v13  ;;  %v30_v22 = vcvt.s32.f32 %v26_v16 }
   0x8   :  { %vm31_vm0 = vcmp.gt.f32.partialorder %v27_v17, 0.5  ;;  %vm32_vm1 = vcmp.gt.f32.partialorder %v28_v18, 0.5  ;;  %vm33_vm2 = vcmp.gt.f32.partialorder %v29_v21, 0.5  ;;  %vm34_vm3 = vcmp.gt.f32.partialorder %v30_v22, 0.5 }
   0x9   :  { %v43_v25 = vsel %vm31_vm0, %v35_v4, %v39_v5  ;;  %v44_v26 = vsel %vm32_vm1, %v36_v10, %v40_v11  ;;  %v45_v29 = vsel %vm33_vm2, %v37_v19, %v41_v20  ;;  %v46_v30 = vsel %vm34_vm3, %v38_v23, %v42_v24 }
   0xa   :  { %v51_v27 = vand.u32 2147483647, %v43_v25  ;;  %v52_v28 = vand.u32 2147483647, %v44_v26  ;;  %v53_v33 = vand.u32 2147483647, %v45_v29 }
   0xb   :  { %v54_v34 = vand.u32 2147483647, %v46_v30  ;;  %v47_v49 = vmax.f32 %v43_v25, 0.0  ;;  %v48_v51 = vmax.f32 %v44_v26, 0.0  ;;  %v49_v54 = vmax.f32 %v45_v29, 0.0 }
   0xc   :  { %v55_v31 = vsub.f32 0.0, %v51_v27  ;;  %v56_v32 = vsub.f32 0.0, %v52_v28  ;;  %v57_v37 = vsub.f32 0.0, %v53_v33  ;;  %v50_v57 = vmax.f32 %v46_v30, 0.0 }
   0xd   :  { %v58_v38 = vsub.f32 0.0, %v54_v34 }
   0xe   :  { %v59_v35 = vmul.f32 1.442695, %v55_v31  ;;  %v61_v36 = vmul.f32 1.442695, %v56_v32  ;;  %v63_v39 = vmul.f32 1.442695, %v57_v37 }
   0xf   :  { %v65_v40 = vmul.f32 1.442695, %v58_v38 }
  0x10   :  { %91 = vpow2.f32 %v59_v35 }
  0x11   :  { %93 = vpow2.f32 %v61_v36 }
  0x12   :  { %95 = vpow2.f32 %v63_v39 }
  0x13   :  { %97 = vpow2.f32 %v65_v40 }
  0x1d   :  { %v92_v41 = vpop.eup %91 }
  0x1e   :  { %v94_v42 = vpop.eup %93  ;;  %v67_v43 = vadd.f32 1.0, %v92_v41 }
  0x1f   :  { %v96_v44 = vpop.eup %95  ;;  %v68_v45 = vadd.f32 1.0, %v94_v42 }
  0x20   :  { %v98_v46 = vpop.eup %97  ;;  %99 = vlog2.f32 %v67_v43  ;;  %v69_v47 = vadd.f32 1.0, %v96_v44 }
  0x21   :  { %101 = vlog2.f32 %v68_v45  ;;  %v70_v48 = vadd.f32 1.0, %v98_v46 }
  0x22   :  { %103 = vlog2.f32 %v69_v47 }
  0x23   :  { %105 = vlog2.f32 %v70_v48 }
  0x2d   :  { %v100_v50 = vpop.eup %99 }
  0x2e   :  { %v102_v52 = vpop.eup %101  ;;  %v72_v53 = vmul.f32 0.6931472, %v100_v50 }
  0x2f   :  { %v104_v55 = vpop.eup %103  ;;  %v74_v56 = vmul.f32 0.6931472, %v102_v52 }
  0x30   :  { %v106_v58 = vpop.eup %105  ;;  %v79_v59 = vadd.f32 %v72_v53, %v47_v49  ;;  %v76_v60 = vmul.f32 0.6931472, %v104_v55 }
  0x31   :  { %v80_v61 = vadd.f32 %v74_v56, %v48_v51  ;;  %v78_v62 = vmul.f32 0.6931472, %v106_v58 }
  0x32   :  { %83 = vst [vmem:[%s169_s3] sm:$0xff] %v79_v59  ;;  %v81_v63 = vadd.f32 %v76_v60, %v49_v54 }
  0x33   :  { %84 = vst [vmem:[%s169_s3 + $0x8] sm:$0xff] %v80_v61  ;;  %v82_v0 = vadd.f32 %v78_v62, %v50_v57 }
  0x34   :  { %85 = vst [vmem:[%s169_s3 + $0x10] sm:$0xff] %v81_v63 }
  0x35   :  { %86 = vst [vmem:[%s169_s3 + $0x18] sm:$0xff] %v82_v0 }

// kernel: instance_balanced_ce_loss.4
= control target key start
LH: loop header
LB: loop body
LE: loop exit
PB: predicated region body
PF: predicated region fallthrough
CT: control target
= control target key end

     0   :  { %s81_s0 = inlined_call_operand.vmem [shape: f32[32,128], index: 0, kind: input, shape index: {}]   ;;  %s82_s1 = inlined_call_operand.vmem [shape: f32[32,128], index: 1, kind: input, shape index: {}]   ;;  %s83_s2 = inlined_call_operand.vmem [shape: f32[8,128], index: 2, kind: output, shape index: {}]  }
   0x1   :  { %v17_v0 = vld [vmem:[%s81_s0] sm:$0xff]  ;;  %v18_v1 = vld [vmem:[%s81_s0 + $0x8] sm:$0xff]  ;;  %v19_v2 = vld [vmem:[%s81_s0 + $0x10] sm:$0xff] }
   0x2   :  { %v20_v3 = vld [vmem:[%s81_s0 + $0x18] sm:$0xff]  ;;  %v21_v4 = vld [vmem:[%s82_s1] sm:$0xff]  ;;  %v22_v5 = vld [vmem:[%s82_s1 + $0x8] sm:$0xff] }
   0x3   :  { %v23_v6 = vld [vmem:[%s82_s1 + $0x10] sm:$0xff]  ;;  %v24_v7 = vld [vmem:[%s82_s1 + $0x18] sm:$0xff]  ;;  %v25_v8 = vmul.f32 %v21_v4, %v17_v0  ;;  %v26_v9 = vmul.f32 %v22_v5, %v18_v1 }
   0x4   :  { %v27_v10 = vmul.f32 %v23_v6, %v19_v2  ;;  %v28_v11 = vmul.f32 %v24_v7, %v20_v3 }
   0x5   :  { %v29_v12 = vadd.f32 %v26_v9, %v25_v8 }
   0x7   :  { %v30_v13 = vadd.f32 %v29_v12, %v27_v10 }
   0x9   :  { %v31_v14 = vadd.f32 %v30_v13, %v28_v11 }
   0xb   :  { %33 = vst [vmem:[%s83_s2] sm:$0xff] %v31_v14 }

// kernel: instance_balanced_ce_loss.5
= control target key start
LH: loop header
LB: loop body
LE: loop exit
PB: predicated region body
PF: predicated region fallthrough
CT: control target
= control target key end

     0   :  { %s719_s18 = smov 0   ;;  %s721_s19 = smov 0   ;;  %s795_s0 = inlined_call_operand.vmem [shape: f32[64,128], index: 0, kind: input, shape index: {}]   ;;  %s796_s1 = inlined_call_operand.vmem [shape: f32[64,128], index: 1, kind: input, shape index: {}]   ;;  %s797_s2 = inlined_call_operand.vmem [shape: s8[64,128], index: 2, kind: input, shape index: {}]   ;;  %s798_s3 = inlined_call_operand.vmem [shape: f32[64,128], index: 3, kind: input, shape index: {}]   ;;  %s799_s4 = inlined_call_operand.vmem [shape: s8[64,128], index: 4, kind: input, shape index: {}]   ;;  %s800_s5 = inlined_call_operand.vmem [shape: f32[2,4,8,128], index: 5, kind: output, shape index: {}]  }
   0x1   :  { %s723_s20 = smov 0  }
   0x2 LB: > { %s27_s21 = sadd.s32 1, %s683_s19  ;;  %p604_p0 = scmp.ge.s32.totalorder %s687_s20, 1  ;;  %s687_s20 = sphi %s723_s20, %s15_s20   ;;  %s683_s19 = sphi %s721_s19, %s802_s19   ;;  %s679_s18 = sphi %s719_s18, %s801_s18  }
   0x3   : > { %p29_p1 = scmp.ge.s32.totalorder %s27_s21, 2  ;;  %p260_p2 = scmp.lt.s32.totalorder %s687_s20, 3 }
   0x5   : > { %s804_s21 = smov (%p29_p1, %s27_s21), 0  ;;  %p261_p3 = pnand %p604_p0, %p260_p2 }
   0x6   : > { %p328_p4 = scmp.lt.s32.totalorder (!%p261_p3), %s679_s18, 1  ;;  %s605_s22 = sshll.u32 (!%p261_p3), %s679_s18, 2 }
   0x7   : > { %264 = sbr.rel (%p261_p3) target bundleno = 74 (0x4a), region = 40  ;;  %p313_p5 = scmp.lt.s32.totalorder (!%p261_p3), %s605_s22, 7 }
   0xc   : > { %s806_s18 = smov (!%p328_p4, %s679_s18), 1  ;;  %s808_s22 = smov (!%p313_p5, %s605_s22), 7 }
   0xd   : > { %s609_s23 = sshll.u32 %s806_s18, 3  ;;  %s740_s24 = sshll.u32 %s808_s22, 3 }
   0xe   : > { %s316_s27 = scalar_lea.vmem %s795_s0, %s740_s24  ;;  %s324_s30 = scalar_lea.vmem %s796_s1, %s740_s24 }
   0xf   : > { %s331_s8 = scalar_lea.vmem %s797_s2, %s609_s23  ;;  %v360_v0 = vld [vmem:[%s316_s27] sm:$0xff]  ;;  %v361_v1 = vld [vmem:[%s316_s27 + $0x8] sm:$0xff]  ;;  %v362_v2 = vld [vmem:[%s316_s27 + $0x10] sm:$0xff]  ;;  %s345_s11 = scalar_lea.vmem %s799_s4, %s609_s23 }
  0x10   : > { %v363_v3 = vld [vmem:[%s316_s27 + $0x18] sm:$0xff]  ;;  %v364_v4 = vld [vmem:[%s324_s30] sm:$0xff]  ;;  %v365_v5 = vld [vmem:[%s324_s30 + $0x8] sm:$0xff]  ;;  %s338_s14 = scalar_lea.vmem %s798_s3, %s740_s24  ;;  %s623_s15 = sshll.u32 %s806_s18, 5 }
  0x11   : > { %v366_v6 = vld [vmem:[%s324_s30 + $0x10] sm:$0xff]  ;;  %v367_v7 = vld [vmem:[%s324_s30 + $0x18] sm:$0xff]  ;;  %v368_v8 = vld [vmem:[%s331_s8] sm:$0xff]  ;;  %v381_v9 = vsub.f32 %v360_v0, %v364_v4  ;;  %v382_v10 = vsub.f32 %v361_v1, %v365_v5  ;;  %v385_v11 = vsub.f32 %v364_v4, %v360_v0  ;;  %v386_v12 = vsub.f32 %v365_v5, %v361_v1  ;;  %s776_s22 = scalar_lea.vmem %s800_s5, %s623_s15 }
  0x12   : > { %v369_v13 = vunpack.c.0.s8 %v368_v8  ;;  %v370_v14 = vunpack.c.1.s8 %v368_v8  ;;  %v371_v15 = vunpack.c.2.s8 %v368_v8  ;;  %v372_v16 = vunpack.c.3.s8 %v368_v8  ;;  %v433_v21 = vld [vmem:[%s345_s11] sm:$0xff]  ;;  %v430_v46 = vld [vmem:[%s338_s14 + $0x8] sm:$0xff]  ;;  %v431_v47 = vld [vmem:[%s338_s14 + $0x10] sm:$0xff] }
  0x13   : > { %v383_v17 = vsub.f32 %v362_v2, %v366_v6  ;;  %v384_v18 = vsub.f32 %v363_v3, %v367_v7  ;;  %v387_v19 = vsub.f32 %v366_v6, %v362_v2  ;;  %v388_v20 = vsub.f32 %v367_v7, %v363_v3  ;;  %v429_v39 = vld [vmem:[%s338_s14] sm:$0xff]  ;;  %v432_v49 = vld [vmem:[%s338_s14 + $0x18] sm:$0xff] }
  0x14   : > { %v373_v22 = vcvt.s32.f32 %v369_v13  ;;  %v374_v23 = vcvt.s32.f32 %v370_v14  ;;  %v375_v24 = vcvt.s32.f32 %v371_v15  ;;  %v376_v25 = vcvt.s32.f32 %v372_v16 }
  0x15   : > { %v434_v26 = vunpack.c.0.s8 %v433_v21  ;;  %v435_v27 = vunpack.c.1.s8 %v433_v21  ;;  %v436_v28 = vunpack.c.2.s8 %v433_v21  ;;  %v437_v29 = vunpack.c.3.s8 %v433_v21 }
  0x16   : > { %vm377_vm0 = vcmp.gt.f32.partialorder %v373_v22, 0.5  ;;  %vm378_vm1 = vcmp.gt.f32.partialorder %v374_v23, 0.5  ;;  %vm379_vm2 = vcmp.gt.f32.partialorder %v375_v24, 0.5  ;;  %vm380_vm3 = vcmp.gt.f32.partialorder %v376_v25, 0.5 }
  0x17   : > { %v760_v30 = vsel %vm377_vm0, %v381_v9, %v385_v11  ;;  %v762_v31 = vsel %vm378_vm1, %v382_v10, %v386_v12  ;;  %v764_v32 = vsel %vm379_vm2, %v383_v17, %v387_v19  ;;  %v766_v33 = vsel %vm380_vm3, %v384_v18, %v388_v20 }
  0x18   : > { %v397_v34 = vand.u32 2147483647, %v760_v30  ;;  %v398_v35 = vand.u32 2147483647, %v762_v31  ;;  %v399_v36 = vand.u32 2147483647, %v764_v32  ;;  %v438_v37 = vcvt.s32.f32 %v434_v26 }
  0x19   : > { %v400_v38 = vand.u32 2147483647, %v766_v33  ;;  %v439_v40 = vcvt.s32.f32 %v435_v27  ;;  %v440_v41 = vcvt.s32.f32 %v436_v28  ;;  %v441_v42 = vcvt.s32.f32 %v437_v29 }
  0x1a   : > { %v401_v43 = vsub.f32 0.0, %v397_v34  ;;  %v402_v44 = vsub.f32 0.0, %v398_v35  ;;  %v403_v45 = vsub.f32 0.0, %v399_v36  ;;  %vm442_vm4 = vcmp.gt.f32.partialorder %v438_v37, 0.5 }
  0x1b   : > { %v404_v48 = vsub.f32 0.0, %v400_v38  ;;  %vm443_vm5 = vcmp.gt.f32.partialorder %v439_v40, 0.5  ;;  %vm444_vm6 = vcmp.gt.f32.partialorder %v440_v41, 0.5  ;;  %vm445_vm7 = vcmp.gt.f32.partialorder %v441_v42, 0.5 }
  0x1c   : > { %v405_v50 = vmul.f32 1.442695, %v401_v43  ;;  %v407_v51 = vmul.f32 1.442695, %v402_v44  ;;  %v409_v52 = vmul.f32 1.442695, %v403_v45 }
  0x1d   : > { %v411_v53 = vmul.f32 1.442695, %v404_v48  ;;  %v446_v54 = vsel %vm442_vm4, %v429_v39, 0.0  ;;  %v447_v55 = vsel %vm443_vm5, %v430_v46, 0.0  ;;  %v448_v56 = vsel %vm444_vm6, %v431_v47, 0.0 }
  0x1e   : > { %649 = vpow2.f32 %v405_v50  ;;  %v450_v57 = vsub.f32 %v429_v39, %v446_v54  ;;  %v451_v58 = vsub.f32 %v430_v46, %v447_v55  ;;  %v449_v59 = vsel %vm445_vm7, %v432_v49, 0.0 }
  0x1f   : > { %651 = vpow2.f32 %v407_v51  ;;  %v477_v60 = vadd.f32 %v447_v55, %v446_v54  ;;  %v452_v61 = vsub.f32 %v431_v47, %v448_v56  ;;  %v453_v0 = vsub.f32 %v432_v49, %v449_v59 }
  0x20   : > { %653 = vpow2.f32 %v409_v52  ;;  %v484_v62 = vadd.f32 %v451_v58, %v450_v57  ;;  %v393_v12 = vmax.f32 %v760_v30, 0.0  ;;  %v394_v14 = vmax.f32 %v762_v31, 0.0 }
  0x21   : > { %655 = vpow2.f32 %v411_v53  ;;  %v478_v63 = vadd.f32 %v477_v60, %v448_v56  ;;  %v395_v16 = vmax.f32 %v764_v32, 0.0  ;;  %v396_v19 = vmax.f32 %v766_v33, 0.0 }
  0x22   : > { %v485_v1 = vadd.f32 %v484_v62, %v452_v61 }
  0x23   : > { %v479_v2 = vadd.f32 %v478_v63, %v449_v59 }
  0x24   : > { %v486_v3 = vadd.f32 %v485_v1, %v453_v0 }
  0x25   : > { %618 = vst [vmem:[%s776_s22 + $0x10] sm:$0xff] %v479_v2 }
  0x26   : > { %620 = vst [vmem:[%s776_s22 + $0x18] sm:$0xff] %v486_v3 }
  0x2b   : > { %v650_v4 = vpop.eup %649 }
  0x2c   : > { %v652_v5 = vpop.eup %651  ;;  %v413_v6 = vadd.f32 1.0, %v650_v4 }
  0x2d   : > { %v654_v7 = vpop.eup %653  ;;  %v414_v8 = vadd.f32 1.0, %v652_v5 }
  0x2e   : > { %v656_v9 = vpop.eup %655  ;;  %v415_v10 = vadd.f32 1.0, %v654_v7  ;;  %657 = vlog2.f32 %v413_v6 }
  0x2f   : > { %v416_v11 = vadd.f32 1.0, %v656_v9  ;;  %659 = vlog2.f32 %v414_v8 }
  0x30   : > { %661 = vlog2.f32 %v415_v10 }
  0x31   : > { %663 = vlog2.f32 %v416_v11 }
  0x3b   : > { %v658_v13 = vpop.eup %657 }
  0x3c   : > { %v660_v15 = vpop.eup %659  ;;  %v418_v17 = vmul.f32 0.6931472, %v658_v13 }
  0x3d   : > { %v662_v18 = vpop.eup %661  ;;  %v420_v20 = vmul.f32 0.6931472, %v660_v15 }
  0x3e   : > { %v664_v21 = vpop.eup %663  ;;  %v422_v22 = vmul.f32 0.6931472, %v662_v18  ;;  %v425_v23 = vadd.f32 %v418_v17, %v393_v12 }
  0x3f   : > { %v424_v24 = vmul.f32 0.6931472, %v664_v21  ;;  %v426_v25 = vadd.f32 %v420_v20, %v394_v14 }
  0x40   : > { %v427_v26 = vadd.f32 %v422_v22, %v395_v16  ;;  %v455_v27 = vmul.f32 %v446_v54, %v425_v23  ;;  %v466_v28 = vmul.f32 %v450_v57, %v425_v23 }
  0x41   : > { %v428_v29 = vadd.f32 %v424_v24, %v396_v19  ;;  %v456_v30 = vmul.f32 %v447_v55, %v426_v25  ;;  %v467_v31 = vmul.f32 %v451_v58, %v426_v25 }
  0x42   : > { %v457_v34 = vmul.f32 %v448_v56, %v427_v26  ;;  %v468_v32 = vmul.f32 %v452_v61, %v427_v26 }
  0x43   : > { %v458_v35 = vmul.f32 %v449_v59, %v428_v29  ;;  %v459_v36 = vadd.f32 %v456_v30, %v455_v27  ;;  %v469_v37 = vmul.f32 %v453_v0, %v428_v29  ;;  %v470_v33 = vadd.f32 %v467_v31, %v466_v28 }
  0x45   : > { %v460_v38 = vadd.f32 %v459_v36, %v457_v34  ;;  %v471_v39 = vadd.f32 %v470_v33, %v468_v32 }
  0x47   : > { %v461_v40 = vadd.f32 %v460_v38, %v458_v35  ;;  %v472_v41 = vadd.f32 %v471_v39, %v469_v37 }
  0x49   : > { %463 = vst [vmem:[%s776_s22] sm:$0xff] %v461_v40  ;;  %616 = vst [vmem:[%s776_s22 + $0x8] sm:$0xff] %v472_v41 }
  0x4a PF: > { %s15_s20 = sadd.s32 1, %s687_s20   ;;  %s801_s18 = smov %s683_s19 }
  0x4b   : > { %p12_p6 = scmp.ge.s32.totalorder %s15_s20, 4   ;;  %s802_s19 = smov %s804_s21 }
  0x4d   :  { %14 = sbr.rel (!%p12_p6) target bundleno = 2 (0x2), region = 89 }

</bundles_post_ra>
